<compile_context>
chip_gen: v7x
topology: tpu7x:2x2x1
jax: 0.10.0
libtpu: 0.0.40
codegen_flags: <defaults>
</compile_context>

<pallas_src>
import functools

import jax
import jax.numpy as jnp
from jax import lax
from jax.experimental import pallas as pl
from jax.experimental.pallas import tpu as pltpu


def _round_up(x, m):
    return ((x + m - 1) // m) * m


def _patch_embed_matmul_kernel(p_ref, w_ref, b_ref, o_ref, acc_ref):
    # p_ref: (tm, tk) bf16 flattened-patch rows
    # w_ref: (tn, tk) bf16 weight rows (natural (E, K) layout)
    # b_ref: (1, tn) f32 bias
    # o_ref: (tm, tn) f32 output tile
    # acc_ref: (tm, tn) f32 accumulator scratch (resident across the K axis)
    k = pl.program_id(2)

    @pl.when(k == 0)
    def _():
        acc_ref[...] = jnp.zeros_like(acc_ref)

    # Contract K on both operands: (tm, tk) x (tn, tk) -> (tm, tn).
    acc_ref[...] += lax.dot_general(
        p_ref[...], w_ref[...],
        dimension_numbers=(((1,), (1,)), ((), ())),
        preferred_element_type=jnp.float32)

    @pl.when(k == pl.num_programs(2) - 1)
    def _():
        o_ref[...] = (acc_ref[...] + b_ref[...]).astype(o_ref.dtype)


@functools.partial(jax.jit, static_argnames=("patch_size",))
def patch_embed_3d(x, weight, bias, patch_size):
    """x: (B, C, D, H, W); weight: (E, C, pD, pH, pW); bias: (E,).

    Returns (B, num_patches, E), identical to
    nn.Conv3d(C, E, kernel_size=patch_size, stride=patch_size)(x)
      .flatten(2).transpose(1, 2)
    (assumes D,H,W divisible by patch_size, as the module's img_size implies).
    """
    B, C, D, H, W = x.shape
    pD, pH, pW = patch_size
    E = weight.shape[0]
    nD, nH, nW = D // pD, H // pH, W // pW
    N = nD * nH * nW
    K = C * pD * pH * pW
    M = B * N
    out_dtype = x.dtype

    # Patch extraction: layout-only ops, fused into the kernel input DMA via
    # allow_input_fusion under jit (patch flatten order (C,pD,pH,pW) matches
    # the Conv3d weight flatten order).
    xp = x.reshape(B, C, nD, pD, nH, pH, nW, pW)
    xp = xp.transpose(0, 2, 4, 6, 1, 3, 5, 7)        # (B, nD, nH, nW, C, pD, pH, pW)
    patches = xp.reshape(M, K).astype(jnp.bfloat16)  # (B*N, K)

    w2d = weight.reshape(E, K).astype(jnp.bfloat16)  # (E, K): no transpose needed
    b2d = bias.astype(jnp.float32).reshape(1, E)

    # Tile sizes: 256 matches the v6e/v7x MXU; small dims fall back to the
    # (8,128)-aligned full extent.  K is tiled so VMEM stays bounded.
    tm = min(256, _round_up(M, 8))
    tn = min(256, _round_up(E, 128))
    tk = min(512, _round_up(K, 128))
    Mp, Ep, Kp = _round_up(M, tm), _round_up(E, tn), _round_up(K, tk)

    if (Mp, Kp) != (M, K):
        patches = jnp.pad(patches, ((0, Mp - M), (0, Kp - K)))
    if (Ep, Kp) != (E, K):
        w2d = jnp.pad(w2d, ((0, Ep - E), (0, Kp - K)))
    if Ep != E:
        b2d = jnp.pad(b2d, ((0, 0), (0, Ep - E)))

    grid = (Mp // tm, Ep // tn, Kp // tk)

    out = pl.pallas_call(
        _patch_embed_matmul_kernel,
        out_shape=jax.ShapeDtypeStruct((Mp, Ep), jnp.float32),
        grid_spec=pltpu.PrefetchScalarGridSpec(
            num_scalar_prefetch=0,
            grid=grid,
            in_specs=[
                pl.BlockSpec((tm, tk), lambda i, j, k: (i, k)),   # patches
                pl.BlockSpec((tn, tk), lambda i, j, k: (j, k)),   # weight (E,K)
                pl.BlockSpec((1, tn), lambda i, j, k: (0, j)),    # bias
            ],
            out_specs=pl.BlockSpec((tm, tn), lambda i, j, k: (i, j)),
            scratch_shapes=[pltpu.VMEM((tm, tn), jnp.float32)],
        ),
        compiler_params=pltpu.CompilerParams(
            dimension_semantics=("parallel", "parallel", "arbitrary"),
            vmem_limit_bytes=32 * 1024 * 1024,
            allow_input_fusion=[True, False, False],
        ),
    )(patches, w2d, b2d)

    out = out[:M, :E].astype(out_dtype)
    return out.reshape(B, N, E)


if __name__ == "__main__":
    # Small shapes consistent with the module: img (16,16,16), patch (8,8,8),
    # in_chans=1, embed_dim=32 -> num_patches = 8, K = 512.
    img_size = (16, 16, 16)
    patch_size = (8, 8, 8)
    in_chans = 1
    embed_dim = 32
    B = 2

    key = jax.random.PRNGKey(0)
    kx, kw, kb = jax.random.split(key, 3)

    x = jax.random.normal(kx, (B, in_chans, *img_size), dtype=jnp.float32)
    fan_in = in_chans * patch_size[0] * patch_size[1] * patch_size[2]
    weight = jax.random.normal(
        kw, (embed_dim, in_chans, *patch_size), dtype=jnp.float32) / jnp.sqrt(fan_in)
    bias = jax.random.normal(kb, (embed_dim,), dtype=jnp.float32) * 0.01

    out = patch_embed_3d(x, weight, bias, patch_size)
    out = jax.block_until_ready(out)

    # Reference: actual strided conv3d + flatten(2) + transpose(1,2), in f32.
    ref = lax.conv_general_dilated(
        x, weight, window_strides=patch_size, padding="VALID",
        dimension_numbers=("NCDHW", "OIDHW", "NCDHW"))
    ref = ref + bias[None, :, None, None, None]
    ref = ref.reshape(B, embed_dim, -1).transpose(0, 2, 1)

    num_patches = (img_size[0] // patch_size[0]) * (img_size[1] // patch_size[1]) * \
        (img_size[2] // patch_size[2])
    assert out.shape == (B, num_patches, embed_dim), out.shape
    # bf16 inputs with f32 accumulation -> loosen tolerance vs the f32 reference.
    assert jnp.allclose(out, ref, atol=5e-2, rtol=5e-2), float(
        jnp.max(jnp.abs(out - ref)))

    print("KERNEL_OK")
</pallas_src>

<mosaic_0001>
module attributes {stable_mosaic.version = 11 : i64} {
  func.func @_patch_embed_matmul_kernel(%arg0: i32, %arg1: i32, %arg2: i32, %arg3: memref<16x512xbf16, #tpu.memory_space<vmem>>, %arg4: memref<128x512xbf16, #tpu.memory_space<vmem>>, %arg5: memref<1x128xf32, #tpu.memory_space<vmem>>, %arg6: memref<16x128xf32, #tpu.memory_space<vmem>>, %arg7: memref<16x128xf32, #tpu.memory_space<vmem>>) attributes {dimension_semantics = [#tpu.dimension_semantics<parallel>, #tpu.dimension_semantics<parallel>, #tpu.dimension_semantics<arbitrary>], iteration_bounds = array<i64: 1, 1, 1>, scalar_prefetch = 0 : i64, scratch_operands = 1 : i64, tpu.core_type = #tpu.core_type<tc>, window_params = [{transform_indices = @transform_0, window_bounds = array<i64: 16, 512>}, {transform_indices = @transform_1, window_bounds = array<i64: 128, 512>}, {transform_indices = @transform_2, window_bounds = array<i64: 1, 128>}, {transform_indices = @transform_3, window_bounds = array<i64: 16, 128>}]} {
    %c0_i32 = arith.constant 0 : i32
    %0 = arith.cmpi eq, %arg2, %c0_i32 : i32
    %1 = arith.extui %0 : i1 to i32
    %c0_i32_0 = arith.constant 0 : i32
    %2 = arith.cmpi ne, %1, %c0_i32_0 : i32
    scf.if %2 {
      %cst_10 = arith.constant 0.000000e+00 : f32
      %12 = vector.broadcast %cst_10 : f32 to vector<16x128xf32>
      %c0_11 = arith.constant 0 : index
      %c0_12 = arith.constant 0 : index
      %13 = vector.load %arg7[%c0_11, %c0_12] : memref<16x128xf32, #tpu.memory_space<vmem>>, vector<16x128xf32>
      tpu.vector_store %arg7[%c0_11, %c0_12], %12 {strides = array<i32>} : memref<16x128xf32, #tpu.memory_space<vmem>>, vector<16x128xf32>,
    } else {
    }
    %c0 = arith.constant 0 : index
    %c0_1 = arith.constant 0 : index
    %3 = vector.load %arg7[%c0, %c0_1] : memref<16x128xf32, #tpu.memory_space<vmem>>, vector<16x128xf32>
    %c0_2 = arith.constant 0 : index
    %c0_3 = arith.constant 0 : index
    %4 = vector.load %arg3[%c0_2, %c0_3] : memref<16x512xbf16, #tpu.memory_space<vmem>>, vector<16x512xbf16>
    %c0_4 = arith.constant 0 : index
    %c0_5 = arith.constant 0 : index
    %5 = vector.load %arg4[%c0_4, %c0_5] : memref<128x512xbf16, #tpu.memory_space<vmem>>, vector<128x512xbf16>
    %cst = arith.constant dense<0.000000e+00> : vector<16x128xf32>
    %6 = tpu.matmul %4, %5, %cst {dimension_numbers = #tpu.dot_dimension_numbers<[1], [1], [0], [0], [0, 0, 1, 0], [], []>} : vector<16x512xbf16>, vector<128x512xbf16>, vector<16x128xf32> -> vector<16x128xf32>
    %7 = arith.addf %3, %6 : vector<16x128xf32>
    %c0_6 = arith.constant 0 : index
    %c0_7 = arith.constant 0 : index
    %8 = vector.load %arg7[%c0_6, %c0_7] : memref<16x128xf32, #tpu.memory_space<vmem>>, vector<16x128xf32>
    tpu.vector_store %arg7[%c0_6, %c0_7], %7 {strides = array<i32>} : memref<16x128xf32, #tpu.memory_space<vmem>>, vector<16x128xf32>,
    %c0_i32_8 = arith.constant 0 : i32
    %9 = arith.cmpi eq, %arg2, %c0_i32_8 : i32
    %10 = arith.extui %9 : i1 to i32
    %c0_i32_9 = arith.constant 0 : i32
    %11 = arith.cmpi ne, %10, %c0_i32_9 : i32
    scf.if %11 {
      %c0_10 = arith.constant 0 : index
      %c0_11 = arith.constant 0 : index
      %12 = vector.load %arg7[%c0_10, %c0_11] : memref<16x128xf32, #tpu.memory_space<vmem>>, vector<16x128xf32>
      %c0_12 = arith.constant 0 : index
      %c0_13 = arith.constant 0 : index
      %13 = vector.load %arg5[%c0_12, %c0_13] : memref<1x128xf32, #tpu.memory_space<vmem>>, vector<1x128xf32>
      %14 = vector.broadcast %13 : vector<1x128xf32> to vector<16x128xf32>
      %15 = arith.addf %12, %14 : vector<16x128xf32>
      %c0_14 = arith.constant 0 : index
      %c0_15 = arith.constant 0 : index
      %16 = vector.load %arg6[%c0_14, %c0_15] : memref<16x128xf32, #tpu.memory_space<vmem>>, vector<16x128xf32>
      tpu.vector_store %arg6[%c0_14, %c0_15], %15 {strides = array<i32>} : memref<16x128xf32, #tpu.memory_space<vmem>>, vector<16x128xf32>,
    } else {
    }
    return
  }
  func.func @transform_0(%arg0: i32, %arg1: i32, %arg2: i32) -> (i32, i32) {
    %c0_i32 = arith.constant 0 : i32
    return %arg0, %arg2 : i32, i32
  }
  func.func @transform_1(%arg0: i32, %arg1: i32, %arg2: i32) -> (i32, i32) {
    %c0_i32 = arith.constant 0 : i32
    return %arg1, %arg2 : i32, i32
  }
  func.func @transform_2(%arg0: i32, %arg1: i32, %arg2: i32) -> (i32, i32) {
    %c0_i32 = arith.constant 0 : i32
    %c0_i32_0 = arith.constant 0 : i32
    return %c0_i32, %arg1 : i32, i32
  }
  func.func @transform_3(%arg0: i32, %arg1: i32, %arg2: i32) -> (i32, i32) {
    %c0_i32 = arith.constant 0 : i32
    return %arg0, %arg1 : i32, i32
  }
}

</mosaic_0001>

<bundles_post_ra>
// kernel: patch_embed_3d.1
= control target key start
LH: loop header
LB: loop body
LE: loop exit
PB: predicated region body
PF: predicated region fallthrough
CT: control target
= control target key end

     0   :  { %s573_s1 = inlined_call_operand.vmem [shape: bf16[128,512], index: 1, kind: input, shape index: {}]   ;;  %s574_s0 = inlined_call_operand.vmem [shape: bf16[16,512], index: 0, kind: input, shape index: {}]   ;;  %s575_s2 = inlined_call_operand.vmem [shape: f32[1,128], index: 2, kind: input, shape index: {}]   ;;  %s576_s3 = inlined_call_operand.vmem [shape: f32[16,128], index: 3, kind: output, shape index: {}]  }
   0x1   :  { %v382_v0 = vld [vmem:[%s573_s1 + $0x4] ss:$16 sps:$4 sm:$0xff]   ;;  %v384_v1 = vld [vmem:[%s573_s1 + $0xc] ss:$16 sps:$4 sm:$0xff]   ;;  %v386_v2 = vld [vmem:[%s573_s1] ss:$16 sps:$4 sm:$0xff]  }
   0x2   :  { %239 = vmatprep.subr.bf16.mxu0 %v382_v0  ;;  %v387_v3 = vld [vmem:[%s573_s1 + $0x8] ss:$16 sps:$4 sm:$0xff]   ;;  %280 = vmatprep.subr.bf16.mxu1 %v384_v1  ;;  %v388_v4 = vld [vmem:[%s573_s1 + $0x24] ss:$16 sps:$4 sm:$0xff]   ;;  %v390_v5 = vld [vmem:[%s573_s1 + $0x2c] ss:$16 sps:$4 sm:$0xff]  }
   0x3   :  { %240 = vmatpush1.bf16.xpose.msra.mxu0 %v386_v2  ;;  %281 = vmatpush1.bf16.xpose.msra.mxu1 %v387_v3  ;;  %v392_v6 = vld [vmem:[%s573_s1 + $0x20] ss:$16 sps:$4 sm:$0xff]   ;;  %v393_v7 = vld [vmem:[%s573_s1 + $0x28] ss:$16 sps:$4 sm:$0xff]   ;;  %v394_v8 = vld [vmem:[%s573_s1 + $0x44] ss:$16 sps:$4 sm:$0xff]  }
   0x4   :  { %241 = vmatprep.subr.bf16.mxu0 %v388_v4  ;;  %282 = vmatprep.subr.bf16.mxu1 %v390_v5  ;;  %v396_v9 = vld [vmem:[%s573_s1 + $0x4c] ss:$16 sps:$4 sm:$0xff]   ;;  %v398_v10 = vld [vmem:[%s573_s1 + $0x40] ss:$16 sps:$4 sm:$0xff]   ;;  %v399_v11 = vld [vmem:[%s573_s1 + $0x48] ss:$16 sps:$4 sm:$0xff]  }
   0x5   :  { %v400_v12 = vld [vmem:[%s573_s1 + $0x64] ss:$16 sps:$4 sm:$0xff]   ;;  %v402_v13 = vld [vmem:[%s573_s1 + $0x6c] ss:$16 sps:$4 sm:$0xff]   ;;  %v404_v16 = vld [vmem:[%s573_s1 + $0x60] ss:$16 sps:$4 sm:$0xff]  }
   0x6   :  { %v432_v14 = vld [vmem:[%s574_s0 + $0x4] ss:$16 sps:$4 sm:$0xff]   ;;  %v435_v15 = vld [vmem:[%s574_s0 + $0xc] ss:$16 sps:$4 sm:$0xff]   ;;  %v405_v17 = vld [vmem:[%s573_s1 + $0x68] ss:$16 sps:$4 sm:$0xff]  }
   0x7   :  { %271 = vmatprep.mubr.bf16.mxu0 %v432_v14  ;;  %v406_v18 = vld [vmem:[%s573_s1 + $0x84] ss:$16 sps:$4 sm:$0xff]   ;;  %v408_v19 = vld [vmem:[%s573_s1 + $0x8c] ss:$16 sps:$4 sm:$0xff]   ;;  %312 = vmatprep.mubr.bf16.mxu1 %v435_v15  ;;  %v410_v20 = vld [vmem:[%s573_s1 + $0x80] ss:$16 sps:$4 sm:$0xff]  }
   0x8   :  { %v411_v21 = vld [vmem:[%s573_s1 + $0x88] ss:$16 sps:$4 sm:$0xff]   ;;  %v412_v22 = vld [vmem:[%s573_s1 + $0xa4] ss:$16 sps:$4 sm:$0xff]   ;;  %v414_v23 = vld [vmem:[%s573_s1 + $0xac] ss:$16 sps:$4 sm:$0xff]  }
   0x9   :  { %v416_v24 = vld [vmem:[%s573_s1 + $0xa0] ss:$16 sps:$4 sm:$0xff]   ;;  %v417_v25 = vld [vmem:[%s573_s1 + $0xa8] ss:$16 sps:$4 sm:$0xff]   ;;  %v418_v26 = vld [vmem:[%s573_s1 + $0xc4] ss:$16 sps:$4 sm:$0xff]  }
   0xa   :  { %v420_v27 = vld [vmem:[%s573_s1 + $0xcc] ss:$16 sps:$4 sm:$0xff]   ;;  %v422_v28 = vld [vmem:[%s573_s1 + $0xc0] ss:$16 sps:$4 sm:$0xff]   ;;  %v423_v29 = vld [vmem:[%s573_s1 + $0xc8] ss:$16 sps:$4 sm:$0xff]  }
   0xb   :  { %242 = vmatpush1.bf16.xpose.msra.mxu0 %v392_v6  ;;  %283 = vmatpush1.bf16.xpose.msra.mxu1 %v393_v7  ;;  %v424_v30 = vld [vmem:[%s573_s1 + $0xe4] ss:$16 sps:$4 sm:$0xff]   ;;  %v426_v31 = vld [vmem:[%s573_s1 + $0xec] ss:$16 sps:$4 sm:$0xff]   ;;  %v428_v32 = vld [vmem:[%s573_s1 + $0xe0] ss:$16 sps:$4 sm:$0xff]  }
   0xc   :  { %243 = vmatprep.subr.bf16.mxu0 %v394_v8  ;;  %284 = vmatprep.subr.bf16.mxu1 %v396_v9  ;;  %v429_v33 = vld [vmem:[%s573_s1 + $0xe8] ss:$16 sps:$4 sm:$0xff]   ;;  %v430_v34 = vld [vmem:[%s574_s0] ss:$16 sps:$4 sm:$0xff]  }
   0xd   :  { %v433_v35 = vld [vmem:[%s574_s0 + $0x8] ss:$16 sps:$4 sm:$0xff]   ;;  %v381_v38 = vld [vmem:[%s575_s2] ss:$0 sm:$0xff] }
  0x13   :  { %244 = vmatpush1.bf16.xpose.msra.mxu0 %v398_v10  ;;  %285 = vmatpush1.bf16.xpose.msra.mxu1 %v399_v11 }
  0x14   :  { %245 = vmatprep.subr.bf16.mxu0 %v400_v12  ;;  %286 = vmatprep.subr.bf16.mxu1 %v402_v13 }
  0x1b   :  { %246 = vmatpush1.bf16.xpose.msra.mxu0 %v404_v16  ;;  %287 = vmatpush1.bf16.xpose.msra.mxu1 %v405_v17 }
  0x1c   :  { %247 = vmatprep.subr.bf16.mxu0 %v406_v18  ;;  %288 = vmatprep.subr.bf16.mxu1 %v408_v19 }
  0x23   :  { %248 = vmatpush1.bf16.xpose.msra.mxu0 %v410_v20  ;;  %289 = vmatpush1.bf16.xpose.msra.mxu1 %v411_v21 }
  0x24   :  { %249 = vmatprep.subr.bf16.mxu0 %v412_v22  ;;  %290 = vmatprep.subr.bf16.mxu1 %v414_v23 }
  0x2b   :  { %250 = vmatpush1.bf16.xpose.msra.mxu0 %v416_v24  ;;  %291 = vmatpush1.bf16.xpose.msra.mxu1 %v417_v25 }
  0x2c   :  { %251 = vmatprep.subr.bf16.mxu0 %v418_v26  ;;  %292 = vmatprep.subr.bf16.mxu1 %v420_v27 }
  0x33   :  { %252 = vmatpush1.bf16.xpose.msra.mxu0 %v422_v28  ;;  %293 = vmatpush1.bf16.xpose.msra.mxu1 %v423_v29 }
  0x34   :  { %253 = vmatprep.subr.bf16.mxu0 %v424_v30  ;;  %294 = vmatprep.subr.bf16.mxu1 %v426_v31 }
  0x3b   :  { %254 = vmatpush1.bf16.xpose.msra.mxu0 %v428_v32  ;;  %295 = vmatpush1.bf16.xpose.msra.mxu1 %v429_v33 }
  0x42   :  { %272 = vmatmul.mubr.bf16.vlgmr.msra.gmra.mrb[0].mxu0 %v430_v34  ;;  %313 = vmatmul.mubr.bf16.vlgmr.msra.gmra.mrb[0].mxu1 %v433_v35 }
 0x115   :  { %v273_v36 = vpop.f32.mrb[0].mxu0  ;;  %v314_v37 = vpop.f32.mrb[0].mxu1 }
 0x116   :  { %v315_v39 = vadd.f32 %v314_v37, %v273_v36  ;;  %v275_v40 = vpop.f32.mrb[1].mxu0  ;;  %v316_v41 = vpop.f32.mrb[1].mxu1 }
 0x117   :  { %v276_v42 = vpop.f32.mrb[2].mxu0  ;;  %v317_v43 = vpop.f32.mrb[2].mxu1 }
 0x118   :  { %v337_v44 = vadd.f32 %v381_v38, %v315_v39  ;;  %v318_v45 = vadd.f32 %v317_v43, %v276_v42  ;;  %v278_v46 = vpop.f32.mrb[3].mxu0  ;;  %v319_v47 = vpop.f32.mrb[3].mxu1 }
 0x11a   :  { %339 = vst [vmem:[%s576_s3] sm:$0xff] %v337_v44  ;;  %v338_v48 = vadd.f32 %v381_v38, %v318_v45 }
 0x11c   :  { %340 = vst [vmem:[%s576_s3 + $0x8] sm:$0xff] %v338_v48 }

</bundles_post_ra>
